<compile_context>
chip_gen: v7x
topology: tpu7x:2x2x1
jax: 0.10.0
libtpu: 0.0.40
codegen_flags: <defaults>
</compile_context>

<pallas_src>
import functools
import math

import jax
import jax.numpy as jnp
from jax.experimental import pallas as pl
from jax.experimental.pallas import tpu as pltpu


def attention_kernel(x_ref, w_ref, b_ref, o_ref, *, seq_len):
    # x_ref : (Bb, Tp, Cp)   bf16   batch tile (lane-dense Cp, padded Tp)
    # w_ref : (Cp, 3*Cp)     bf16   fused [Wq*scale | Wk | Wv], VMEM-resident
    # b_ref : (1, 3*Cp)      f32    fused [bq*scale | bk | bv], VMEM-resident
    # o_ref : (Bb, Tp, Cp)   f32
    Bb, Tp, Cp = x_ref.shape

    # Flatten (Bb, Tp) -> rows so the projection fills the MXU M-dimension.
    x2 = x_ref[...].reshape(Bb * Tp, Cp)                      # bf16 (rows, Cp)

    # Single fused qkv projection: one MXU push/drain, N = 3*Cp.
    qkv = jnp.dot(x2, w_ref[...], preferred_element_type=jnp.float32)
    qkv = qkv + b_ref[...]                                    # f32 (rows, 3*Cp)

    # Lane-aligned slices at Cp (multiple-of-128) boundaries: free.
    q = qkv[:, 0 * Cp:1 * Cp].reshape(Bb, Tp, Cp).astype(jnp.bfloat16)
    k = qkv[:, 1 * Cp:2 * Cp].reshape(Bb, Tp, Cp).astype(jnp.bfloat16)
    v = qkv[:, 2 * Cp:3 * Cp].reshape(Bb, Tp, Cp).astype(jnp.bfloat16)

    # Scores: contract the shared feature axis directly (no XLU transpose),
    # f32 accumulation.  Score scale already folded into Wq/bq.
    s = jnp.einsum("bqc,bkc->bqk", q, k,
                   preferred_element_type=jnp.float32)        # (Bb, Tp, Tp)

    # Mask padded key columns (zero-padded sequence positions get bias-valued
    # k rows, so they MUST be excluded from the softmax).
    if Tp != seq_len:
        col = jax.lax.broadcasted_iota(jnp.int32, (1, 1, Tp), 2)
        s = jnp.where(col < seq_len, s, -1e30)

    # Numerically stable softmax in f32; reciprocal on the EUP (approx ->
    # rows normalized only to ~1e-3 relative error; fine at the stated tol).
    s = s - jnp.max(s, axis=-1, keepdims=True)
    p = jnp.exp(s)
    p = p * pl.reciprocal(jnp.sum(p, axis=-1, keepdims=True), approx=True)

    out = jnp.einsum("bqk,bkc->bqc", p.astype(jnp.bfloat16), v,
                     preferred_element_type=jnp.float32)      # (Bb, Tp, Cp)
    o_ref[...] = out.astype(o_ref.dtype)


def _round_up(n, m):
    return (n + m - 1) // m * m


def prepare_attention_params(w_attn, b_attn):
    """One-time weight preprocessing (hoisted out of the forward path).

    w_attn: (C, 3C) in x @ W form; b_attn: (3C,).
    Returns (w_qkv (Cp, 3*Cp) bf16, b_qkv (1, 3*Cp) f32) with the 1/sqrt(C)
    score scale folded into Wq/bq and feature dims zero-padded to Cp=128k.
    """
    C = w_attn.shape[0]
    Cp = _round_up(C, 128)
    scale = 1.0 / math.sqrt(C)

    wq = w_attn[:, 0 * C:1 * C] * scale     # fold score scale in f32
    wk = w_attn[:, 1 * C:2 * C]
    wv = w_attn[:, 2 * C:3 * C]
    pad_w = ((0, Cp - C), (0, Cp - C))
    w_qkv = jnp.concatenate(
        [jnp.pad(wq, pad_w), jnp.pad(wk, pad_w), jnp.pad(wv, pad_w)], axis=1
    ).astype(jnp.bfloat16)                                    # (Cp, 3*Cp)

    bq = b_attn[0 * C:1 * C] * scale
    bk = b_attn[1 * C:2 * C]
    bv = b_attn[2 * C:3 * C]
    pad_b = ((0, Cp - C),)
    b_qkv = jnp.concatenate(
        [jnp.pad(bq, pad_b), jnp.pad(bk, pad_b), jnp.pad(bv, pad_b)], axis=0
    ).reshape(1, 3 * Cp).astype(jnp.float32)                  # (1, 3*Cp)

    return w_qkv, b_qkv


def attention_forward(x, w_qkv, b_qkv, out_dtype=jnp.float32):
    """x: (B, T, C) f32; (w_qkv, b_qkv) from prepare_attention_params."""
    B, T, C = x.shape
    Cp = w_qkv.shape[0]
    Tp = _round_up(T, 128)          # lane-dense key axis / score matrix

    # Zero-pad batch-padding handled below; sequence/feature padding here.
    # Padded feature lanes of W/b are zero -> padded q/k/v lanes are zero and
    # contribute nothing; padded key columns are masked in-kernel; padded
    # query rows / batch elements produce values that are sliced off.
    xp = jnp.pad(x, ((0, 0), (0, Tp - T), (0, Cp - C))).astype(jnp.bfloat16)

    # Block sizing: fill the MXU M dim (~512 rows target for v6e/v7x), keep
    # the f32 score block under a VMEM budget, and cap bb at B//2 so the grid
    # has >= 2 steps whenever B >= 2 (v7x has 2 TensorCores).
    rows_target = 512
    score_budget = 8 * 1024 * 1024
    bb = max(1, rows_target // Tp)
    bb = min(bb, max(1, score_budget // (Tp * Tp * 4)))
    bb = min(bb, B)
    bb = min(bb, max(1, B // 2))
    Bp = _round_up(B, bb)           # pad batch for awkward B instead of bb=1
    if Bp != B:
        xp = jnp.pad(xp, ((0, Bp - B), (0, 0), (0, 0)))
    grid = (Bp // bb,)

    out_itemsize = jnp.dtype(out_dtype).itemsize

    # Explicit scoped-VMEM budget from the per-block working set.
    ws = (
        2 * bb * Tp * Cp * 2              # x tile (bf16, double-buffered)
        + Cp * 3 * Cp * 2                 # fused weights (bf16, resident)
        + 3 * Cp * 4                      # fused bias (f32, resident)
        + bb * Tp * 3 * Cp * (4 + 2)      # qkv f32 + bf16 q/k/v casts
        + bb * Tp * Tp * (4 + 2)          # scores f32 + probs bf16
        + 2 * bb * Tp * Cp * out_itemsize  # out tile (double-buffered)
    )
    vmem_limit = int(min(64 * 1024 * 1024, max(32 * 1024 * 1024, 2 * ws)))

    cost = pl.CostEstimate(
        flops=2 * Bp * Tp * Cp * (3 * Cp) + 4 * Bp * Tp * Tp * Cp,
        transcendentals=Bp * Tp * Tp,
        bytes_accessed=int(xp.size * 2 + w_qkv.size * 2 + b_qkv.size * 4
                           + Bp * Tp * Cp * out_itemsize),
    )

    out_p = pl.pallas_call(
        functools.partial(attention_kernel, seq_len=T),
        out_shape=jax.ShapeDtypeStruct((Bp, Tp, Cp), out_dtype),
        grid_spec=pltpu.PrefetchScalarGridSpec(
            num_scalar_prefetch=0,
            grid=grid,
            in_specs=[
                pl.BlockSpec((bb, Tp, Cp), lambda i: (i, 0, 0)),  # x batch tile
                # Grid-invariant operands: whole-array VMEM residency (single
                # copy, no per-step double-buffering of the weights).
                pl.BlockSpec(memory_space=pltpu.MemorySpace.VMEM),  # fused W
                pl.BlockSpec(memory_space=pltpu.MemorySpace.VMEM),  # fused b
            ],
            out_specs=pl.BlockSpec((bb, Tp, Cp), lambda i: (i, 0, 0)),
        ),
        compiler_params=pltpu.CompilerParams(
            dimension_semantics=("parallel",),
            vmem_limit_bytes=vmem_limit,
        ),
        cost_estimate=cost,
    )(xp, w_qkv, b_qkv)

    # At production shapes (T, C multiples of 128, B multiple of bb) this
    # slice is a no-op; otherwise it trims the padding.
    return out_p[:B, :T, :C]


def reference_forward(x, w_attn, b_attn):
    B, T, C = x.shape
    qkv = jnp.einsum("btc,cd->btd", x, w_attn) + b_attn
    q, k, v = qkv[..., :C], qkv[..., C:2 * C], qkv[..., 2 * C:]
    att = jnp.einsum("btc,bsc->bts", q, k) / math.sqrt(C)
    att = jax.nn.softmax(att, axis=-1)
    return jnp.einsum("bts,bsc->btc", att, v)


if __name__ == "__main__":
    # Small shapes consistent with the module: B=2, T=8, C=n_embd=32.
    B, T, C = 2, 8, 32

    key = jax.random.PRNGKey(0)
    kx, kw, kb = jax.random.split(key, 3)

    x = jax.random.normal(kx, (B, T, C), dtype=jnp.float32)
    # nn.Linear(n_embd, 3*n_embd) weight stored directly in x @ W form: (C, 3C).
    w_attn = jax.random.normal(kw, (C, 3 * C), dtype=jnp.float32) * 0.02
    b_attn = jax.random.normal(kb, (3 * C,), dtype=jnp.float32) * 0.02

    # One-time weight preprocessing (not on the per-call forward path).
    w_qkv, b_qkv = prepare_attention_params(w_attn, b_attn)
    w_qkv, b_qkv = jax.block_until_ready((w_qkv, b_qkv))

    fwd = jax.jit(attention_forward)
    out = fwd(x, w_qkv, b_qkv)
    out = jax.block_until_ready(out)

    ref = reference_forward(x, w_attn, b_attn)
    assert out.shape == (B, T, C)
    # bf16 MXU inputs with f32 accumulation + approx reciprocal -> mixed
    # precision tolerance (softmax rows normalized to ~1e-3 relative).
    assert jnp.allclose(out, ref, atol=1e-2, rtol=1e-2), float(
        jnp.max(jnp.abs(out - ref))
    )

    print("KERNEL_OK")
</pallas_src>

<mosaic_0001>
module attributes {stable_mosaic.version = 11 : i64} {
  func.func @attention_kernel(%arg0: i32, %arg1: memref<1x128x128xbf16, #tpu.memory_space<vmem>>, %arg2: memref<128x384xbf16, #tpu.memory_space<vmem>>, %arg3: memref<1x384xf32, #tpu.memory_space<vmem>>, %arg4: memref<1x128x128xf32, #tpu.memory_space<vmem>>) attributes {dimension_semantics = [#tpu.dimension_semantics<parallel>], iteration_bounds = array<i64: 2>, scalar_prefetch = 0 : i64, scratch_operands = 0 : i64, tpu.core_type = #tpu.core_type<tc>, window_params = [{transform_indices = @transform_0, window_bounds = array<i64: 1, 128, 128>}, {pipeline_mode = #tpu.pipeline_mode<synchronous>, transform_indices = @transform_1, window_bounds = array<i64: 128, 384>}, {pipeline_mode = #tpu.pipeline_mode<synchronous>, transform_indices = @transform_2, window_bounds = array<i64: 1, 384>}, {transform_indices = @transform_3, window_bounds = array<i64: 1, 128, 128>}]} {
    %c0 = arith.constant 0 : index
    %c0_0 = arith.constant 0 : index
    %c0_1 = arith.constant 0 : index
    %0 = vector.load %arg1[%c0, %c0_0, %c0_1] : memref<1x128x128xbf16, #tpu.memory_space<vmem>>, vector<1x128x128xbf16>
    %1 = vector.shape_cast %0 : vector<1x128x128xbf16> to vector<128x128xbf16>
    %c0_2 = arith.constant 0 : index
    %c0_3 = arith.constant 0 : index
    %2 = vector.load %arg2[%c0_2, %c0_3] : memref<128x384xbf16, #tpu.memory_space<vmem>>, vector<128x384xbf16>
    %cst = arith.constant dense<0.000000e+00> : vector<128x384xf32>
    %3 = tpu.matmul %1, %2, %cst {dimension_numbers = #tpu.dot_dimension_numbers<[1], [0], [0], [1], [0, 0, 1, 1], [], []>} : vector<128x128xbf16>, vector<128x384xbf16>, vector<128x384xf32> -> vector<128x384xf32>
    %c0_4 = arith.constant 0 : index
    %c0_5 = arith.constant 0 : index
    %4 = vector.load %arg3[%c0_4, %c0_5] : memref<1x384xf32, #tpu.memory_space<vmem>>, vector<1x384xf32>
    %5 = vector.broadcast %4 : vector<1x384xf32> to vector<128x384xf32>
    %6 = arith.addf %3, %5 : vector<128x384xf32>
    %7 = vector.extract_strided_slice %6 {offsets = [0, 0], sizes = [128, 128], strides = [1, 1]} : vector<128x384xf32> to vector<128x128xf32>
    %8 = vector.shape_cast %7 : vector<128x128xf32> to vector<1x128x128xf32>
    %9 = arith.truncf %8 : vector<1x128x128xf32> to vector<1x128x128xbf16>
    %10 = vector.extract_strided_slice %6 {offsets = [0, 128], sizes = [128, 128], strides = [1, 1]} : vector<128x384xf32> to vector<128x128xf32>
    %11 = vector.shape_cast %10 : vector<128x128xf32> to vector<1x128x128xf32>
    %12 = arith.truncf %11 : vector<1x128x128xf32> to vector<1x128x128xbf16>
    %13 = vector.extract_strided_slice %6 {offsets = [0, 256], sizes = [128, 128], strides = [1, 1]} : vector<128x384xf32> to vector<128x128xf32>
    %14 = vector.shape_cast %13 : vector<128x128xf32> to vector<1x128x128xf32>
    %15 = arith.truncf %14 : vector<1x128x128xf32> to vector<1x128x128xbf16>
    "tpu.trace_start"() <{level = 10 : i32, message = "bqc,bkc->bqk"}> : () -> ()
    %cst_6 = arith.constant dense<0.000000e+00> : vector<1x128x128xf32>
    %16 = tpu.matmul %9, %12, %cst_6 {dimension_numbers = #tpu.dot_dimension_numbers<[2], [2], [1], [1], [0, 0, 0, 1, 1, 1], [0], [0]>} : vector<1x128x128xbf16>, vector<1x128x128xbf16>, vector<1x128x128xf32> -> vector<1x128x128xf32>
    "tpu.trace_stop"() : () -> ()
    %17 = tpu.iota {dimensions = array<i32: 2>} : vector<1x1x128xi32>
    %c8_i32 = arith.constant 8 : i32
    %18 = vector.broadcast %c8_i32 : i32 to vector<1x1x128xi32>
    %19 = arith.cmpi slt, %17, %18 : vector<1x1x128xi32>
    %cst_7 = arith.constant -1.000000e+30 : f32
    %20 = vector.shape_cast %19 : vector<1x1x128xi1> to vector<1x1x128xi1>
    %21 = vector.broadcast %20 : vector<1x1x128xi1> to vector<1x128x128xi1>
    %22 = vector.broadcast %cst_7 : f32 to vector<1x128x128xf32>
    %23 = arith.select %21, %16, %22 : vector<1x128x128xi1>, vector<1x128x128xf32>
    %cst_8 = arith.constant dense<0xFF800000> : vector<1x128xf32>
    %24 = vector.multi_reduction <maximumf>, %23, %cst_8 [2] : vector<1x128x128xf32> to vector<1x128xf32>
    %25 = vector.shape_cast %24 : vector<1x128xf32> to vector<1x128x1xf32>
    %26 = vector.broadcast %25 : vector<1x128x1xf32> to vector<1x128x128xf32>
    %27 = arith.subf %23, %26 : vector<1x128x128xf32>
    %28 = math.exp %27 : vector<1x128x128xf32>
    %cst_9 = arith.constant dense<0.000000e+00> : vector<1x128xf32>
    %29 = vector.multi_reduction <add>, %28, %cst_9 [2] : vector<1x128x128xf32> to vector<1x128xf32>
    %30 = vector.shape_cast %29 : vector<1x128xf32> to vector<1x128x1xf32>
    %31 = tpu.reciprocal %30 {approx = true} : vector<1x128x1xf32> -> vector<1x128x1xf32>
    %32 = vector.broadcast %31 : vector<1x128x1xf32> to vector<1x128x128xf32>
    %33 = arith.mulf %28, %32 : vector<1x128x128xf32>
    %34 = arith.truncf %33 : vector<1x128x128xf32> to vector<1x128x128xbf16>
    "tpu.trace_start"() <{level = 10 : i32, message = "bqk,bkc->bqc"}> : () -> ()
    %cst_10 = arith.constant dense<0.000000e+00> : vector<1x128x128xf32>
    %35 = tpu.matmul %34, %15, %cst_10 {dimension_numbers = #tpu.dot_dimension_numbers<[2], [1], [1], [2], [0, 0, 0, 1, 1, 2], [0], [0]>} : vector<1x128x128xbf16>, vector<1x128x128xbf16>, vector<1x128x128xf32> -> vector<1x128x128xf32>
    "tpu.trace_stop"() : () -> ()
    %c0_11 = arith.constant 0 : index
    %c0_12 = arith.constant 0 : index
    %c0_13 = arith.constant 0 : index
    %36 = vector.load %arg4[%c0_11, %c0_12, %c0_13] : memref<1x128x128xf32, #tpu.memory_space<vmem>>, vector<1x128x128xf32>
    tpu.vector_store %arg4[%c0_11, %c0_12, %c0_13], %35 {strides = array<i32>} : memref<1x128x128xf32, #tpu.memory_space<vmem>>, vector<1x128x128xf32>,
    return
  }
  func.func @transform_0(%arg0: i32) -> (i32, i32, i32) {
    %c0_i32 = arith.constant 0 : i32
    %c0_i32_0 = arith.constant 0 : i32
    %c0_i32_1 = arith.constant 0 : i32
    return %arg0, %c0_i32, %c0_i32_0 : i32, i32, i32
  }
  func.func @transform_1(%arg0: i32) -> (i32, i32) {
    %c0_i32 = arith.constant 0 : i32
    %c0_i32_0 = arith.constant 0 : i32
    %c0_i32_1 = arith.constant 0 : i32
    return %c0_i32, %c0_i32_0 : i32, i32
  }
  func.func @transform_2(%arg0: i32) -> (i32, i32) {
    %c0_i32 = arith.constant 0 : i32
    %c0_i32_0 = arith.constant 0 : i32
    %c0_i32_1 = arith.constant 0 : i32
    return %c0_i32, %c0_i32_0 : i32, i32
  }
  func.func @transform_3(%arg0: i32) -> (i32, i32, i32) {
    %c0_i32 = arith.constant 0 : i32
    %c0_i32_0 = arith.constant 0 : i32
    %c0_i32_1 = arith.constant 0 : i32
    return %arg0, %c0_i32, %c0_i32_0 : i32, i32, i32
  }
}

</mosaic_0001>

<bundles_post_ra>
// kernel: attention_forward.1
= control target key start
LH: loop header
LB: loop body
LE: loop exit
PB: predicated region body
PF: predicated region fallthrough
CT: control target
= control target key end

     0   :  { %8 = vsyncpa [#allocation3], 0  ;;  %s1493_s12 = smov 0   ;;  %s1820_s0 = inlined_call_operand.vmem [shape: bf16[2,128,128], index: 0, kind: input, shape index: {}]   ;;  %s1821_s1 = inlined_call_operand.hbm [shape: bf16[128,384], index: 1, kind: input, shape index: {}]   ;;  %s1822_s2 = inlined_call_operand.vmem [shape: f32[1,384], index: 2, kind: input, shape index: {}]   ;;  %s1823_s3 = inlined_call_operand.vmem [shape: f32[2,128,128], index: 3, kind: output, shape index: {}]  }
   0x1 LB: > { %s1499_s13 = sadd.s32 4294967295, %s1467_s12   ;;  %p1114_p0 = scmp.ge.s32.totalorder %s1467_s12, 1  ;;  %s1467_s12 = sphi %s1493_s12, %s14_s12  }
   0x2   : > { %p113_p1 = scmp.lt.s32.totalorder %s1467_s12, 3  ;;  %s1469_s14 = smov [#allocation2]  }
   0x3   : > { %s125_s15 = sshll.u32 %s1469_s14, 4  ;;  %p1824_p3 = scmp.eq.s32.totalorder %s1499_s13, 0  ;;  %s126_s15 = int_to_ptr.vmem [resolvable:$true] %s125_s15 }
   0x4   : > { %p1503_p2 = pnand %p1114_p0, %p113_p1  ;;  %s1429_s20 = scalar_lea.hbm %s1821_s1, 3072 }
   0x5   : > { %p1430_p6 = scmp.ne.s32.totalorder %s1821_s1, %s1429_s20  ;;  %p1436_p10 = scmp.lt.u32.totalorder %s1429_s20, %s1821_s1 }
   0x6   : > { %s1826_s16 = scalar_select %p1503_p2, 1, 0 }
   0x7   : > { %p1307_p4 = pneg %p1503_p2 }
   0x9   : > { %p1512_p5 = pnand %p1824_p3, %p1307_p4 }
   0xb   : > { %p1431_p7 = pneg %p1512_p5 }
   0xd   : > { %p1432_p8 = pnand %p1431_p7, %p1430_p6 }
   0xf   : > { %p1433_p9 = pneg %p1432_p8 }
  0x11   : > { %p1438_p11 = pnand %p1436_p10, %p1433_p9 }
  0x13   : > { %1441 = shalt.err (!%p1438_p11)
}
  0x14   : > { %s1442_s25 = scalar_lea.vmem %s126_s15, 3072  ;;  %p1450_p1 = scmp.lt.s32.totalorder %s126_s15, %s126_s15 }
  0x15   : > { %p1443_p12 = scmp.ne.s32.totalorder %s126_s15, %s1442_s25  ;;  %p1451_p4 = scmp.lt.s32.totalorder %s1442_s25, %s1442_s25 }
  0x17   : > { %p1445_p13 = pnand %p1443_p12, %p1431_p7  ;;  %p1452_p3 = por %p1451_p4, %p1450_p1 }
  0x19   : > { %p1446_p0 = pneg %p1445_p13 }
  0x1b   : > { %p1453_p2 = pnand %p1452_p3, %p1446_p0 }
  0x1d   : > { %1456 = shalt.err (!%p1453_p2)
}
  0x1e   : > { %s1470_s26 = smov 192   ;;  %s1471_s27 = smov 12  }
  0x1f   : > { %1310 = dma.hbm_to_vmem [thread:$0]  (!%p1512_p5), %s1821_s1, 3072, %s126_s15, [#allocation3], %s1470_s26, %s1470_s26, %s1471_s27  }
  0x20   : > { %p1828_p6 = scmp.ne.s32.totalorder %s1826_s16, 0 }
  0x21   : > { %p1829_p8 = scmp.eq.s32.totalorder (!%p1828_p6), %s1499_s13, 0 }
  0x22   : > { %152 = sbr.rel (%p1828_p6) target bundleno = 1134 (0x46e), region = 32 }
  0x29   : > { %1462 = dma.done.wait (%p1829_p8), [#allocation3], 3072   ;;  %p1830_p7 = pmov %p1829_p8 }
  0x2a   : > { %v1472_v0 = vmov 0   ;;  %p176_p2 = scmp.lt.s32.totalorder %s1499_s13, 1  ;;  %v1325_v1 = vld [vmem:[#allocation2 + $0x4] ss:$12 sps:$4 sm:$0xff]   ;;  %v1327_v2 = vld [vmem:[#allocation2] ss:$12 sps:$4 sm:$0xff]   ;;  %v237_v25 = vlaneseq }
  0x2b   : > { %1464 = vsyncadd (%p1830_p7), [#allocation3], 4294964224  ;;  %460 = vmatprep.mubr.bf16.mxu0 %v1472_v0  ;;  %428 = vmatprep.subr.bf16.mxu0 %v1325_v1  ;;  %v1328_v3 = vld [vmem:[#allocation2 + $0x1c] ss:$12 sps:$4 sm:$0xff]   ;;  %v1330_v4 = vld [vmem:[#allocation2 + $0x18] ss:$12 sps:$4 sm:$0xff]  }
  0x2c   : > { %s1832_s13 = smov (!%p176_p2, %s1499_s13), 1  ;;  %429 = vmatpush1.bf16.msra.mxu0 %v1327_v2  ;;  %v1331_v5 = vld [vmem:[#allocation2 + $0x34] ss:$12 sps:$4 sm:$0xff]   ;;  %v1333_v6 = vld [vmem:[#allocation2 + $0x30] ss:$12 sps:$4 sm:$0xff]   ;;  %v1578_v26 = vshrl.u32 %v237_v25, 7 }
  0x2d   : > { %430 = vmatprep.subr.bf16.mxu0 %v1328_v3  ;;  %s1157_s30 = sshll.u32 %s1832_s13, 6  ;;  %v1334_v7 = vld [vmem:[#allocation2 + $0x4c] ss:$12 sps:$4 sm:$0xff]   ;;  %v1336_v8 = vld [vmem:[#allocation2 + $0x48] ss:$12 sps:$4 sm:$0xff]   ;;  %s1158_s9 = sshll.u32 %s1832_s13, 7 }
  0x2e   : > { %s1546_s6 = scalar_lea.vmem %s1820_s0, %s1157_s30  ;;  %v1337_v10 = vld [vmem:[#allocation2 + $0x64] ss:$12 sps:$4 sm:$0xff]   ;;  %v1339_v11 = vld [vmem:[#allocation2 + $0x60] ss:$12 sps:$4 sm:$0xff]   ;;  %v1340_v12 = vld [vmem:[#allocation2 + $0x7c] ss:$12 sps:$4 sm:$0xff]   ;;  %s1799_s14 = scalar_lea.vmem %s1823_s3, %s1158_s9 }
  0x2f   : > { %v1349_v9 = vld [vmem:[%s1546_s6] sm:$0xff]   ;;  %v1345_v15 = vld [vmem:[#allocation2 + $0x90] ss:$12 sps:$4 sm:$0xff]   ;;  %v1346_v16 = vld [vmem:[#allocation2 + $0xac] ss:$12 sps:$4 sm:$0xff]   ;;  %v239_v27 = vsub.s32 0, %v1578_v26 }
  0x30   : > { %431 = vmatpush1.bf16.msra.mxu0 %v1330_v4  ;;  %1223 = vmatprep.mubr.bf16.mxu1 %v1349_v9  ;;  %v1342_v13 = vld [vmem:[#allocation2 + $0x78] ss:$12 sps:$4 sm:$0xff]   ;;  %v1343_v14 = vld [vmem:[#allocation2 + $0x94] ss:$12 sps:$4 sm:$0xff]   ;;  %v1550_v18 = vld [vmem:[%s1546_s6 + $0x8] sm:$0xff]   ;;  %v243_v29 = vsub.s32 1, %v1578_v26 }
  0x31   : > { %432 = vmatprep.subr.bf16.mxu0 %v1331_v5  ;;  %v1348_v17 = vld [vmem:[#allocation2 + $0xa8] ss:$12 sps:$4 sm:$0xff]   ;;  %v1558_v20 = vld [vmem:[%s1546_s6 + $0x18] sm:$0xff]   ;;  %v1562_v21 = vld [vmem:[%s1546_s6 + $0x20] sm:$0xff]  }
  0x32   : > { %v1554_v19 = vld [vmem:[%s1546_s6 + $0x10] sm:$0xff]   ;;  %v1566_v22 = vld [vmem:[%s1546_s6 + $0x28] sm:$0xff]   ;;  %v1574_v24 = vld [vmem:[%s1546_s6 + $0x38] sm:$0xff]  }
  0x33   : > { %v1570_v23 = vld [vmem:[%s1546_s6 + $0x30] sm:$0xff]   ;;  %v1584_v28 = vld [vmem:[%s1822_s2] sm:$0x7] }
  0x34   : > { %433 = vmatpush1.bf16.msra.mxu0 %v1333_v6  ;;  %v1588_v30 = vrot.slane %v1584_v28, %v239_v27  ;;  %v1591_v32 = vrot.slane %v1584_v28, %v243_v29 }
  0x35   : > { %434 = vmatprep.subr.bf16.mxu0 %v1334_v7 }
  0x38   : > { %435 = vmatpush1.bf16.msra.mxu0 %v1336_v8 }
  0x39   : > { %436 = vmatprep.subr.bf16.mxu0 %v1337_v10 }
  0x3c   : > { %437 = vmatpush1.bf16.msra.mxu0 %v1339_v11 }
  0x3d   : > { %438 = vmatprep.subr.bf16.mxu0 %v1340_v12 }
  0x40   : > { %439 = vmatpush1.bf16.msra.mxu0 %v1342_v13 }
  0x41   : > { %440 = vmatprep.subr.bf16.mxu0 %v1343_v14 }
  0x44   : > { %441 = vmatpush1.bf16.msra.mxu0 %v1345_v15 }
  0x45   : > { %442 = vmatprep.subr.bf16.mxu0 %v1346_v16 }
  0x48   : > { %443 = vmatpush1.bf16.msra.mxu0 %v1348_v17 }
  0x4b   : > { %461 = vmatmul.mubr.bf16.vlgmr.msra.gmra.mrb[0].mxu0 %v1349_v9 }
  0x4c   : > { %470 = vmatprep.mubr.bf16.mxu0 %v1472_v0 }
  0x53   : > { %471 = vmatmul.mubr.bf16.gmra.mrb[4].mxu0 %v1550_v18 }
  0x54   : > { %480 = vmatprep.mubr.bf16.mxu0 %v1472_v0 }
  0x5b   : > { %481 = vmatmul.mubr.bf16.gmra.mrb[8].mxu0 %v1554_v19 }
  0x5c   : > { %490 = vmatprep.mubr.bf16.mxu0 %v1472_v0 }
  0x63   : > { %491 = vmatmul.mubr.bf16.gmra.mrb[12].mxu0 %v1558_v20 }
  0x64   : > { %500 = vmatprep.mubr.bf16.mxu0 %v1472_v0 }
  0x6b   : > { %501 = vmatmul.mubr.bf16.gmra.mrb[16].mxu0 %v1562_v21 }
  0x6c   : > { %510 = vmatprep.mubr.bf16.mxu0 %v1472_v0 }
  0x73   : > { %511 = vmatmul.mubr.bf16.gmra.mrb[20].mxu0 %v1566_v22 }
  0x74   : > { %520 = vmatprep.mubr.bf16.mxu0 %v1472_v0 }
  0x7b   : > { %521 = vmatmul.mubr.bf16.gmra.mrb[24].mxu0 %v1570_v23 }
  0x7c   : > { %530 = vmatprep.mubr.bf16.mxu0 %v1472_v0 }
  0x83   : > { %531 = vmatmul.mubr.bf16.gmra.mrb[28].mxu0 %v1574_v24 }
 0x11e   : > { %v462_v31 = vpop.f32.mrb[0].mxu0 }
 0x11f   : > { %v464_v33 = vpop.f32.mrb[1].mxu0  ;;  %v463_v35 = vadd.f32 %v462_v31, %v1588_v30 }
 0x120   : > { %v466_v34 = vpop.f32.mrb[2].mxu0  ;;  %v465_v38 = vadd.f32 %v464_v33, %v1591_v32 }
 0x121   : > { %v467_v36 = vadd.f32 %v466_v34, %v1588_v30  ;;  %v468_v37 = vpop.f32.mrb[3].mxu0 }
 0x122   : > { %v469_v39 = vadd.f32 %v468_v37, %v1591_v32 }
 0x123   : > { %v638_v40 = vpack.c.bf16 %v467_v36, %v463_v35 }
 0x124   : > { %v646_v41 = vpack.c.bf16 %v469_v39, %v465_v38 }
 0x125   : > { %1255 = vmatprep.mubr.bf16.mxu0 %v638_v40 }
 0x126   : > { %v472_v42 = vpop.f32.mrb[4].mxu0  ;;  %1239 = vmatprep.subr.bf16.mxu0 %v646_v41 }
 0x127   : > { %v1598_v43 = vadd.f32 %v472_v42, %v1588_v30  ;;  %v474_v44 = vpop.f32.mrb[5].mxu0  ;;  %1240 = vmatpush3.bf16.xpose.msra.mxu0 %v646_v41 }
 0x128   : > { %v476_v45 = vpop.f32.mrb[6].mxu0  ;;  %v475_v48 = vadd.f32 %v474_v44, %v1591_v32 }
 0x129   : > { %v1601_v46 = vadd.f32 %v476_v45, %v1588_v30  ;;  %v478_v47 = vpop.f32.mrb[7].mxu0 }
 0x12a   : > { %v479_v49 = vadd.f32 %v478_v47, %v1591_v32 }
 0x12b   : > { %v639_v50 = vpack.c.bf16 %v1601_v46, %v1598_v43  ;;  %v1361_v43 = vld [vmem:[#allocation2 + $0x68] ss:$12 sps:$4 sm:$0xff]   ;;  %v1362_v46 = vld [vmem:[#allocation2 + $0x80] ss:$12 sps:$4 sm:$0xff]  }
 0x12c   : > { %v647_v51 = vpack.c.bf16 %v479_v49, %v475_v48 }
 0x12e   : > { %v482_v52 = vpop.f32.mrb[8].mxu0  ;;  %1241 = vmatprep.subr.bf16.mxu0 %v647_v51 }
 0x12f   : > { %v1608_v53 = vadd.f32 %v482_v52, %v1588_v30  ;;  %v484_v54 = vpop.f32.mrb[9].mxu0  ;;  %1242 = vmatpush3.bf16.xpose.msra.mxu0 %v647_v51 }
 0x130   : > { %v486_v55 = vpop.f32.mrb[10].mxu0  ;;  %v485_v58 = vadd.f32 %v484_v54, %v1591_v32 }
 0x131   : > { %v1611_v56 = vadd.f32 %v486_v55, %v1588_v30  ;;  %v488_v57 = vpop.f32.mrb[11].mxu0 }
 0x132   : > { %v489_v59 = vadd.f32 %v488_v57, %v1591_v32 }
 0x133   : > { %v640_v60 = vpack.c.bf16 %v1611_v56, %v1608_v53  ;;  %v1364_v53 = vld [vmem:[#allocation2 + $0xb0] ss:$12 sps:$4 sm:$0xff]   ;;  %v760_v56 = vand.u32 127, %v237_v25 }
 0x134   : > { %v648_v61 = vpack.c.bf16 %v489_v59, %v485_v58 }
 0x135   : > { %vm761_vm0 = vcmp.lt.s32.totalorder %v760_v56, 8 }
 0x136   : > { %v492_v62 = vpop.f32.mrb[12].mxu0  ;;  %1243 = vmatprep.subr.bf16.mxu0 %v648_v61 }
 0x137   : > { %v493_v63 = vadd.f32 %v492_v62, %v1588_v30  ;;  %v494_v0 = vpop.f32.mrb[13].mxu0  ;;  %1244 = vmatpush3.bf16.xpose.msra.mxu0 %v648_v61 }
 0x138   : > { %v496_v1 = vpop.f32.mrb[14].mxu0  ;;  %v495_v4 = vadd.f32 %v494_v0, %v1591_v32 }
 0x139   : > { %v497_v2 = vadd.f32 %v496_v1, %v1588_v30  ;;  %v498_v3 = vpop.f32.mrb[15].mxu0 }
 0x13a   : > { %v499_v5 = vadd.f32 %v498_v3, %v1591_v32  ;;  %v1360_v3 = vld [vmem:[#allocation2 + $0x50] ss:$12 sps:$4 sm:$0xff]  }
 0x13b   : > { %v641_v6 = vpack.c.bf16 %v497_v2, %v493_v63  ;;  %v1358_v2 = vld [vmem:[#allocation2 + $0x20] ss:$12 sps:$4 sm:$0xff]  }
 0x13c   : > { %v649_v7 = vpack.c.bf16 %v499_v5, %v495_v4 }
 0x13e   : > { %v502_v8 = vpop.f32.mrb[16].mxu0  ;;  %1245 = vmatprep.subr.bf16.mxu0 %v649_v7 }
 0x13f   : > { %v503_v9 = vadd.f32 %v502_v8, %v1588_v30  ;;  %v504_v10 = vpop.f32.mrb[17].mxu0  ;;  %1246 = vmatpush3.bf16.xpose.msra.mxu0 %v649_v7 }
 0x140   : > { %v506_v11 = vpop.f32.mrb[18].mxu0  ;;  %v505_v14 = vadd.f32 %v504_v10, %v1591_v32 }
 0x141   : > { %v507_v12 = vadd.f32 %v506_v11, %v1588_v30  ;;  %v508_v13 = vpop.f32.mrb[19].mxu0 }
 0x142   : > { %v509_v15 = vadd.f32 %v508_v13, %v1591_v32 }
 0x143   : > { %v642_v16 = vpack.c.bf16 %v507_v12, %v503_v9 }
 0x144   : > { %v650_v17 = vpack.c.bf16 %v509_v15, %v505_v14 }
 0x146   : > { %v512_v27 = vpop.f32.mrb[20].mxu0  ;;  %1247 = vmatprep.subr.bf16.mxu0 %v650_v17 }
 0x147   : > { %v513_v29 = vadd.f32 %v512_v27, %v1588_v30  ;;  %v514_v31 = vpop.f32.mrb[21].mxu0  ;;  %1248 = vmatpush3.bf16.xpose.msra.mxu0 %v650_v17 }
 0x148   : > { %v516_v33 = vpop.f32.mrb[22].mxu0  ;;  %v515_v36 = vadd.f32 %v514_v31, %v1591_v32 }
 0x149   : > { %v517_v34 = vadd.f32 %v516_v33, %v1588_v30  ;;  %v518_v35 = vpop.f32.mrb[23].mxu0 }
 0x14a   : > { %v519_v37 = vadd.f32 %v518_v35, %v1591_v32 }
 0x14b   : > { %v643_v38 = vpack.c.bf16 %v517_v34, %v513_v29 }
 0x14c   : > { %v651_v39 = vpack.c.bf16 %v519_v37, %v515_v36 }
 0x14e   : > { %v522_v40 = vpop.f32.mrb[24].mxu0  ;;  %1249 = vmatprep.subr.bf16.mxu0 %v651_v39 }
 0x14f   : > { %v523_v41 = vadd.f32 %v522_v40, %v1588_v30  ;;  %v524_v42 = vpop.f32.mrb[25].mxu0  ;;  %1250 = vmatpush3.bf16.xpose.msra.mxu0 %v651_v39  ;;  %v247_v40 = vsub.s32 2, %v1578_v26 }
 0x150   : > { %v526_v44 = vpop.f32.mrb[26].mxu0  ;;  %v525_v48 = vadd.f32 %v524_v42, %v1591_v32 }
 0x151   : > { %v527_v45 = vadd.f32 %v526_v44, %v1588_v30  ;;  %v528_v47 = vpop.f32.mrb[27].mxu0 }
 0x152   : > { %v529_v49 = vadd.f32 %v528_v47, %v1591_v32 }
 0x153   : > { %v644_v51 = vpack.c.bf16 %v527_v45, %v523_v41 }
 0x154   : > { %v652_v52 = vpack.c.bf16 %v529_v49, %v525_v48  ;;  %v1702_v48 = vrot.slane %v1584_v28, %v247_v40 }
 0x156   : > { %v532_v54 = vpop.f32.mrb[28].mxu0  ;;  %1251 = vmatprep.subr.bf16.mxu0 %v652_v52 }
 0x157   : > { %v533_v55 = vadd.f32 %v532_v54, %v1588_v30  ;;  %v534_v57 = vpop.f32.mrb[29].mxu0  ;;  %1252 = vmatpush3.bf16.xpose.msra.mxu0 %v652_v52 }
 0x158   : > { %v536_v58 = vpop.f32.mrb[30].mxu0  ;;  %v535_v62 = vadd.f32 %v534_v57, %v1591_v32 }
 0x159   : > { %v537_v59 = vadd.f32 %v536_v58, %v1588_v30  ;;  %v538_v61 = vpop.f32.mrb[31].mxu0  ;;  %v1357_v30 = vld [vmem:[#allocation2 + $0x8] ss:$12 sps:$4 sm:$0xff]  }
 0x15a   : > { %v539_v63 = vadd.f32 %v538_v61, %v1591_v32  ;;  %1207 = vmatprep.subr.bf16.mxu1 %v1357_v30  ;;  %v1359_v32 = vld [vmem:[#allocation2 + $0x38] ss:$12 sps:$4 sm:$0xff]  }
 0x15b   : > { %v645_v0 = vpack.c.bf16 %v537_v59, %v533_v55  ;;  %1208 = vmatpush3.bf16.msra.mxu1 %v1357_v30 }
 0x15c   : > { %v653_v1 = vpack.c.bf16 %v539_v63, %v535_v62  ;;  %1209 = vmatprep.subr.bf16.mxu1 %v1358_v2 }
 0x15e   : > { %1253 = vmatprep.subr.bf16.mxu0 %v653_v1 }
 0x15f   : > { %1254 = vmatpush3.bf16.xpose.msra.mxu0 %v653_v1  ;;  %1210 = vmatpush3.bf16.msra.mxu1 %v1358_v2 }
 0x160   : > { %1211 = vmatprep.subr.bf16.mxu1 %v1359_v32 }
 0x163   : > { %1212 = vmatpush3.bf16.msra.mxu1 %v1359_v32 }
 0x164   : > { %1213 = vmatprep.subr.bf16.mxu1 %v1360_v3 }
 0x166   : > { %1256 = vmatmul.mubr.bf16.vlgmr.msra.gmra.mrb[32].mxu0 %v639_v50  ;;  %v1363_v50 = vld [vmem:[#allocation2 + $0x98] ss:$12 sps:$4 sm:$0xff]  }
 0x167   : > { %1259 = vmatprep.mubr.bf16.mxu0 %v640_v60  ;;  %1214 = vmatpush3.bf16.msra.mxu1 %v1360_v3 }
 0x168   : > { %1215 = vmatprep.subr.bf16.mxu1 %v1361_v43 }
 0x16b   : > { %1216 = vmatpush3.bf16.msra.mxu1 %v1361_v43 }
 0x16c   : > { %1217 = vmatprep.subr.bf16.mxu1 %v1362_v46 }
 0x16e   : > { %1260 = vmatmul.mubr.bf16.gmra.mrb[36].mxu0 %v641_v6 }
 0x16f   : > { %1263 = vmatprep.mubr.bf16.mxu0 %v642_v16  ;;  %1218 = vmatpush3.bf16.msra.mxu1 %v1362_v46 }
 0x170   : > { %1219 = vmatprep.subr.bf16.mxu1 %v1363_v50 }
 0x173   : > { %1220 = vmatpush3.bf16.msra.mxu1 %v1363_v50 }
 0x174   : > { %1221 = vmatprep.subr.bf16.mxu1 %v1364_v53 }
 0x176   : > { %1264 = vmatmul.mubr.bf16.gmra.mrb[40].mxu0 %v643_v38 }
 0x177   : > { %1267 = vmatprep.mubr.bf16.mxu0 %v644_v51  ;;  %1222 = vmatpush3.bf16.msra.mxu1 %v1364_v53 }
 0x17a   : > { %1224 = vmatmul.mubr.bf16.vlgmr.msra.gmra.mrb[0].mxu1 %v1550_v18 }
 0x17b   : > { %1227 = vmatprep.mubr.bf16.mxu1 %v1554_v19 }
 0x17e   : > { %1268 = vmatmul.mubr.bf16.gmra.mrb[44].mxu0 %v645_v0 }
 0x182   : > { %1228 = vmatmul.mubr.bf16.gmra.mrb[4].mxu1 %v1558_v20 }
 0x183   : > { %1231 = vmatprep.mubr.bf16.mxu1 %v1562_v21 }
 0x18a   : > { %1232 = vmatmul.mubr.bf16.gmra.mrb[8].mxu1 %v1566_v22 }
 0x18b   : > { %1235 = vmatprep.mubr.bf16.mxu1 %v1570_v23 }
 0x192   : > { %1236 = vmatmul.mubr.bf16.gmra.mrb[12].mxu1 %v1574_v24 }
 0x239   : > { %v1257_v60 = vpop.f32.mrb[32].mxu0 }
 0x23a   : > { %v696_v4 = vpop.f32.mrb[33].mxu0  ;;  %v766_v5 = vsel %vm761_vm0, %v1257_v60, -1e+30 }
 0x23b   : > { %784 = vmax.xlane.f32.xlu1 %v766_v5  ;;  %v1258_v18 = vpop.f32.mrb[34].mxu0  ;;  %v764_v19 = vsel %vm761_vm0, %v696_v4, -1e+30 }
 0x23c   : > { %780 = vmax.xlane.f32.xlu0 %v764_v19  ;;  %v699_v20 = vpop.f32.mrb[35].mxu0  ;;  %v767_v21 = vsel %vm761_vm0, %v1258_v18, -1e+30 }
 0x23d   : > { %v765_v22 = vsel %vm761_vm0, %v699_v20, -1e+30 }
 0x23f   : > { %786 = vmax.xlane.f32.xlu1 %v767_v21 }
 0x240   : > { %782 = vmax.xlane.f32.xlu0 %v765_v22 }
 0x241   : > { %v1261_v23 = vpop.f32.mrb[36].mxu0 }
 0x242   : > { %v712_v24 = vpop.f32.mrb[37].mxu0  ;;  %v1661_v9 = vsel %vm761_vm0, %v1261_v23, -1e+30 }
 0x243   : > { %v1262_v25 = vpop.f32.mrb[38].mxu0  ;;  %v768_v6 = vsel %vm761_vm0, %v712_v24, -1e+30 }
 0x244   : > { %788 = vmax.xlane.f32.xlu0 %v768_v6  ;;  %v715_v7 = vpop.f32.mrb[39].mxu0  ;;  %v1665_v11 = vsel %vm761_vm0, %v1262_v25, -1e+30 }
 0x245   : > { %v1657_v8 = vsel %vm761_vm0, %v715_v7, -1e+30 }
 0x246   : > { %790 = vmax.xlane.f32.xlu1 %v1657_v8 }
 0x248   : > { %792 = vmax.xlane.f32.xlu0 %v1661_v9 }
 0x249   : > { %v1265_v10 = vpop.f32.mrb[40].mxu0 }
 0x24a   : > { %794 = vmax.xlane.f32.xlu1 %v1665_v11  ;;  %v728_v12 = vpop.f32.mrb[41].mxu0  ;;  %v1677_v17 = vsel %vm761_vm0, %v1265_v10, -1e+30 }
 0x24b   : > { %v1266_v13 = vpop.f32.mrb[42].mxu0  ;;  %v1669_v14 = vsel %vm761_vm0, %v728_v12, -1e+30 }
 0x24c   : > { %796 = vmax.xlane.f32.xlu0 %v1669_v14  ;;  %v731_v15 = vpop.f32.mrb[43].mxu0  ;;  %v1681_v29 = vsel %vm761_vm0, %v1266_v13, -1e+30 }
 0x24d   : > { %v1673_v16 = vsel %vm761_vm0, %v731_v15, -1e+30  ;;  %v1225_v55 = vpop.f32.mrb[0].mxu1 }
 0x24e   : > { %798 = vmax.xlane.f32.xlu1 %v1673_v16  ;;  %v584_v57 = vadd.f32 %v1225_v55, %v1702_v48  ;;  %v575_v58 = vpop.f32.mrb[1].mxu1 }
 0x24f   : > { %v576_v26 = vadd.f32 %v575_v58, %v1702_v48  ;;  %v1226_v61 = vpop.f32.mrb[2].mxu1 }
 0x250   : > { %800 = vmax.xlane.f32.xlu0 %v1677_v17  ;;  %v587_v0 = vadd.f32 %v1226_v61, %v1702_v48  ;;  %v578_v28 = vpop.f32.mrb[3].mxu1 }
 0x251   : > { %v1269_v27 = vpop.f32.mrb[44].mxu0  ;;  %v579_v30 = vadd.f32 %v578_v28, %v1702_v48 }
 0x252   : > { %802 = vmax.xlane.f32.xlu1 %v1681_v29  ;;  %v744_v31 = vpop.f32.mrb[45].mxu0  ;;  %v1693_v37 = vsel %vm761_vm0, %v1269_v27, -1e+30  ;;  %v655_v32 = vpack.c.bf16 %v587_v0, %v584_v57 }
 0x253   : > { %v1270_v33 = vpop.f32.mrb[46].mxu0  ;;  %v1685_v34 = vsel %vm761_vm0, %v744_v31, -1e+30  ;;  %v654_v46 = vpack.c.bf16 %v579_v30, %v576_v26 }
 0x254   : > { %804 = vmax.xlane.f32.xlu0 %v1685_v34  ;;  %v747_v35 = vpop.f32.mrb[47].mxu0  ;;  %v1697_v38 = vsel %vm761_vm0, %v1270_v33, -1e+30 }
 0x255   : > { %v1689_v36 = vsel %vm761_vm0, %v747_v35, -1e+30  ;;  %v1229_v60 = vpop.f32.mrb[4].mxu1  ;;  %1271 = vmatprep.subr.bf16.mxu1 %v654_v46 }
 0x256   : > { %806 = vmax.xlane.f32.xlu1 %v1689_v36  ;;  %v591_v18 = vpop.f32.mrb[5].mxu1  ;;  %1272 = vmatpush3.bf16.msra.mxu1 %v654_v46 }
 0x257   : > { %v1230_v23 = vpop.f32.mrb[6].mxu1  ;;  %1273 = vmatprep.subr.bf16.mxu1 %v655_v32 }
 0x258   : > { %808 = vmax.xlane.f32.xlu0 %v1693_v37  ;;  %v603_v25 = vadd.f32 %v1230_v23, %v1702_v48 }
 0x25a   : > { %810 = vmax.xlane.f32.xlu1 %v1697_v38  ;;  %1274 = vmatpush3.bf16.msra.mxu1 %v655_v32 }
 0x2c8   : > { %v785_v39 = vpop.xlane.xlu1 %784 }
 0x2c9   : > { %v814_v41 = vsub.f32 %v766_v5, %v785_v39  ;;  %v781_v42 = vpop.xlane.xlu0 %780  ;;  %v600_v5 = vadd.f32 %v1229_v60, %v1702_v48 }
 0x2ca   : > { %v812_v44 = vsub.f32 %v764_v19, %v781_v42 }
 0x2cb   : > { %v832_v49 = vmul.f32 1.442695, %v814_v41  ;;  %v657_v12 = vpack.c.bf16 %v603_v25, %v600_v5 }
 0x2cc   : > { %v828_v45 = vmul.f32 1.442695, %v812_v44  ;;  %v787_v47 = vpop.xlane.xlu1 %786 }
 0x2cd   : > { %v815_v51 = vsub.f32 %v767_v21, %v787_v47  ;;  %v783_v52 = vpop.xlane.xlu0 %782 }
 0x2ce   : > { %1365 = vpow2.f32 %v828_v45  ;;  %v813_v54 = vsub.f32 %v765_v22, %v783_v52  ;;  %v592_v22 = vadd.f32 %v591_v18, %v1702_v48 }
 0x2cf   : > { %1367 = vpow2.f32 %v832_v49  ;;  %v834_v62 = vmul.f32 1.442695, %v815_v51 }
 0x2d0   : > { %v830_v59 = vmul.f32 1.442695, %v813_v54 }
 0x2d1   : > { %v789_v63 = vpop.xlane.xlu0 %788 }
 0x2d2   : > { %1369 = vpow2.f32 %v830_v59  ;;  %v816_v1 = vsub.f32 %v768_v6, %v789_v63  ;;  %v594_v6 = vpop.f32.mrb[7].mxu1 }
 0x2d3   : > { %v791_v2 = vpop.xlane.xlu1 %790  ;;  %1371 = vpow2.f32 %v834_v62  ;;  %v1233_v39 = vpop.f32.mrb[8].mxu1 }
 0x2d4   : > { %v836_v3 = vmul.f32 1.442695, %v816_v1  ;;  %v817_v43 = vsub.f32 %v1657_v8, %v791_v2  ;;  %v616_v42 = vadd.f32 %v1233_v39, %v1702_v48  ;;  %v607_v44 = vpop.f32.mrb[9].mxu1 }
 0x2d5   : > { %v793_v50 = vpop.xlane.xlu0 %792  ;;  %v608_v49 = vadd.f32 %v607_v44, %v1702_v48  ;;  %v1234_v51 = vpop.f32.mrb[10].mxu1 }
 0x2d6   : > { %1373 = vpow2.f32 %v836_v3  ;;  %v838_v53 = vmul.f32 1.442695, %v817_v43  ;;  %v818_v56 = vsub.f32 %v1661_v9, %v793_v50  ;;  %v595_v9 = vadd.f32 %v594_v6, %v1702_v48  ;;  %v610_v54 = vpop.f32.mrb[11].mxu1 }
 0x2d7   : > { %v795_v4 = vpop.xlane.xlu1 %794  ;;  %v619_v52 = vadd.f32 %v1234_v51, %v1702_v48  ;;  %v611_v58 = vadd.f32 %v610_v54, %v1702_v48  ;;  %v1237_v30 = vpop.f32.mrb[12].mxu1 }
 0x2d8   : > { %v1711_v19 = vpop.eup %1365  ;;  %v840_v20 = vmul.f32 1.442695, %v818_v56  ;;  %v819_v21 = vsub.f32 %v1665_v11, %v795_v4  ;;  %1375 = vpow2.f32 %v838_v53  ;;  %v656_v31 = vpack.c.bf16 %v595_v9, %v592_v22  ;;  %v623_v43 = vpop.f32.mrb[13].mxu1 }
 0x2d9   : > { %v797_v24 = vpop.xlane.xlu0 %796  ;;  %860 = vadd.xlane.f32.xlu0 %v1711_v19  ;;  %v1719_v10 = vpop.eup %1367  ;;  %v659_v26 = vpack.c.bf16 %v619_v52, %v616_v42  ;;  %v658_v0 = vpack.c.bf16 %v611_v58, %v608_v49  ;;  %v632_v3 = vadd.f32 %v1237_v30, %v1702_v48  ;;  %v624_v53 = vadd.f32 %v623_v43, %v1702_v48 }
 0x2da   : > { %1377 = vpow2.f32 %v840_v20  ;;  %v842_v7 = vmul.f32 1.442695, %v819_v21  ;;  %v820_v8 = vsub.f32 %v1669_v14, %v797_v24  ;;  %1275 = vmatprep.subr.bf16.mxu1 %v656_v31  ;;  %v1238_v56 = vpop.f32.mrb[14].mxu1 }
 0x2db   : > { %v799_v11 = vpop.xlane.xlu1 %798  ;;  %1276 = vmatpush3.bf16.msra.mxu1 %v656_v31  ;;  %v626_v60 = vpop.f32.mrb[15].mxu1 }
 0x2dc   : > { %v1721_v13 = vpop.eup %1369  ;;  %v844_v15 = vmul.f32 1.442695, %v820_v8  ;;  %v821_v27 = vsub.f32 %v1673_v16, %v799_v11  ;;  %1379 = vpow2.f32 %v842_v7  ;;  %1277 = vmatprep.subr.bf16.mxu1 %v657_v12  ;;  %v627_v5 = vadd.f32 %v626_v60, %v1702_v48 }
 0x2dd   : > { %v801_v33 = vpop.xlane.xlu0 %800  ;;  %864 = vadd.xlane.f32.xlu0 %v1719_v10  ;;  %862 = vadd.xlane.f32.xlu1 %v1721_v13  ;;  %v1727_v40 = vpop.eup %1371 }
 0x2de   : > { %1381 = vpow2.f32 %v844_v15  ;;  %v846_v14 = vmul.f32 1.442695, %v821_v27  ;;  %v822_v35 = vsub.f32 %v1677_v17, %v801_v33  ;;  %v660_v21 = vpack.c.bf16 %v627_v5, %v624_v53 }
 0x2df   : > { %v803_v41 = vpop.xlane.xlu1 %802  ;;  %1278 = vmatpush3.bf16.msra.mxu1 %v657_v12 }
 0x2e0   : > { %v1730_v16 = vpop.eup %1373  ;;  %v848_v45 = vmul.f32 1.442695, %v822_v35  ;;  %v823_v47 = vsub.f32 %v1681_v29, %v803_v41  ;;  %1383 = vpow2.f32 %v846_v14  ;;  %1279 = vmatprep.subr.bf16.mxu1 %v658_v0 }
 0x2e1   : > { %868 = vadd.xlane.f32.xlu0 %v1730_v16  ;;  %v805_v17 = vpop.xlane.xlu0 %804  ;;  %866 = vadd.xlane.f32.xlu1 %v1727_v40 }
 0x2e2   : > { %1385 = vpow2.f32 %v848_v45  ;;  %v850_v55 = vmul.f32 1.442695, %v823_v47  ;;  %v824_v57 = vsub.f32 %v1685_v34, %v805_v17  ;;  %v1739_v29 = vpop.eup %1375 }
 0x2e3   : > { %v807_v59 = vpop.xlane.xlu1 %806  ;;  %1280 = vmatpush3.bf16.msra.mxu1 %v658_v0 }
 0x2e4   : > { %v1741_v61 = vpop.eup %1377  ;;  %v852_v62 = vmul.f32 1.442695, %v824_v57  ;;  %v825_v63 = vsub.f32 %v1689_v36, %v807_v59  ;;  %1387 = vpow2.f32 %v850_v55  ;;  %1281 = vmatprep.subr.bf16.mxu1 %v659_v26 }
 0x2e5   : > { %872 = vadd.xlane.f32.xlu0 %v1741_v61  ;;  %v809_v28 = vpop.xlane.xlu0 %808  ;;  %870 = vadd.xlane.f32.xlu1 %v1739_v29 }
 0x2e6   : > { %1389 = vpow2.f32 %v852_v62  ;;  %v854_v34 = vmul.f32 1.442695, %v825_v63  ;;  %v826_v1 = vsub.f32 %v1693_v37, %v809_v28  ;;  %v1747_v2 = vpop.eup %1379  ;;  %v635_v37 = vadd.f32 %v1238_v56, %v1702_v48 }
 0x2e7   : > { %v811_v32 = vpop.xlane.xlu1 %810  ;;  %1282 = vmatpush3.bf16.msra.mxu1 %v659_v26 }
 0x2e8   : > { %v1750_v36 = vpop.eup %1381  ;;  %v856_v46 = vmul.f32 1.442695, %v826_v1  ;;  %v827_v50 = vsub.f32 %v1697_v38, %v811_v32  ;;  %1391 = vpow2.f32 %v854_v34  ;;  %v661_v20 = vpack.c.bf16 %v635_v37, %v632_v3  ;;  %1283 = vmatprep.subr.bf16.mxu1 %v660_v21 }
 0x2e9   : > { %876 = vadd.xlane.f32.xlu0 %v1750_v36  ;;  %874 = vadd.xlane.f32.xlu1 %v1747_v2 }
 0x2ea   : > { %1393 = vpow2.f32 %v856_v46  ;;  %v858_v4 = vmul.f32 1.442695, %v827_v50  ;;  %v1758_v18 = vpop.eup %1383 }
 0x2eb   : > { %1284 = vmatpush3.bf16.msra.mxu1 %v660_v21 }
 0x2ec   : > { %v1760_v38 = vpop.eup %1385  ;;  %1395 = vpow2.f32 %v858_v4  ;;  %1285 = vmatprep.subr.bf16.mxu1 %v661_v20 }
 0x2ed   : > { %880 = vadd.xlane.f32.xlu0 %v1760_v38  ;;  %878 = vadd.xlane.f32.xlu1 %v1758_v18 }
 0x2ee   : > { %v1764_v22 = vpop.eup %1387 }
 0x2ef   : > { %1286 = vmatpush3.bf16.msra.mxu1 %v661_v20 }
 0x2f0   : > { %v1766_v23 = vpop.eup %1389 }
 0x2f1   : > { %884 = vadd.xlane.f32.xlu0 %v1766_v23  ;;  %882 = vadd.xlane.f32.xlu1 %v1764_v22 }
 0x2f2   : > { %v1770_v48 = vpop.eup %1391 }
 0x2f4   : > { %v1772_v24 = vpop.eup %1393 }
 0x2f5   : > { %888 = vadd.xlane.f32.xlu0 %v1772_v24  ;;  %886 = vadd.xlane.f32.xlu1 %v1770_v48 }
 0x2f6   : > { %v1776_v25 = vpop.eup %1395 }
 0x2f9   : > { %890 = vadd.xlane.f32.xlu1 %v1776_v25 }
 0x366   : > { %v861_v6 = vpop.xlane.xlu0 %860 }
 0x367   : > { %1397 = vrcp.f32 %v861_v6 }
 0x36a   : > { %v865_v7 = vpop.xlane.xlu0 %864  ;;  %v863_v8 = vpop.xlane.xlu1 %862 }
 0x36b   : > { %1399 = vrcp.f32 %v863_v8 }
 0x36c   : > { %1401 = vrcp.f32 %v865_v7 }
 0x36e   : > { %v869_v9 = vpop.xlane.xlu0 %868  ;;  %v867_v11 = vpop.xlane.xlu1 %866 }
 0x36f   : > { %1403 = vrcp.f32 %v867_v11 }
 0x370   : > { %1405 = vrcp.f32 %v869_v9 }
 0x371   : > { %v1398_v27 = vpop.eup %1397 }
 0x372   : > { %v873_v12 = vpop.xlane.xlu0 %872  ;;  %v871_v15 = vpop.xlane.xlu1 %870  ;;  %v908_v35 = vmul.f32 %v1398_v27, %v1711_v19 }
 0x373   : > { %1407 = vrcp.f32 %v871_v15 }
 0x374   : > { %1409 = vrcp.f32 %v873_v12 }
 0x375   : > { %v1400_v31 = vpop.eup %1399 }
 0x376   : > { %v877_v33 = vpop.xlane.xlu0 %876  ;;  %v875_v14 = vpop.xlane.xlu1 %874  ;;  %v909_v39 = vmul.f32 %v1400_v31, %v1721_v13 }
 0x377   : > { %v1402_v41 = vpop.eup %1401  ;;  %1411 = vrcp.f32 %v875_v14 }
 0x378   : > { %v924_v42 = vpack.c.bf16 %v909_v39, %v908_v35  ;;  %1413 = vrcp.f32 %v877_v33  ;;  %v910_v49 = vmul.f32 %v1402_v41, %v1719_v10 }
 0x379   : > { %v1404_v44 = vpop.eup %1403 }
 0x37a   : > { %v881_v45 = vpop.xlane.xlu0 %880  ;;  %v879_v47 = vpop.xlane.xlu1 %878  ;;  %v911_v51 = vmul.f32 %v1404_v44, %v1727_v40  ;;  %1287 = vmatprep.mubr.bf16.mxu1 %v924_v42 }
 0x37b   : > { %v1406_v17 = vpop.eup %1405  ;;  %1415 = vrcp.f32 %v879_v47 }
 0x37c   : > { %v925_v52 = vpack.c.bf16 %v911_v51, %v910_v49  ;;  %1417 = vrcp.f32 %v881_v45  ;;  %v912_v13 = vmul.f32 %v1406_v17, %v1730_v16 }
 0x37d   : > { %v1408_v54 = vpop.eup %1407 }
 0x37e   : > { %v885_v19 = vpop.xlane.xlu0 %884  ;;  %v883_v55 = vpop.xlane.xlu1 %882  ;;  %1288 = vmatmul.mubr.bf16.vlgmr.msra.gmra.mrb[16].mxu1 %v925_v52  ;;  %v913_v57 = vmul.f32 %v1408_v54, %v1739_v29 }
 0x37f   : > { %v1410_v58 = vpop.eup %1409  ;;  %1419 = vrcp.f32 %v883_v55 }
 0x380   : > { %v926_v59 = vpack.c.bf16 %v913_v57, %v912_v13  ;;  %1421 = vrcp.f32 %v885_v19  ;;  %v914_v62 = vmul.f32 %v1410_v58, %v1741_v61 }
 0x381   : > { %v1412_v26 = vpop.eup %1411 }
 0x382   : > { %v889_v10 = vpop.xlane.xlu0 %888  ;;  %v887_v40 = vpop.xlane.xlu1 %886  ;;  %1291 = vmatprep.mubr.bf16.mxu1 %v926_v59  ;;  %v915_v63 = vmul.f32 %v1412_v26, %v1747_v2 }
 0x383   : > { %v1414_v0 = vpop.eup %1413  ;;  %1423 = vrcp.f32 %v887_v40 }
 0x384   : > { %1425 = vrcp.f32 %v889_v10  ;;  %v927_v28 = vpack.c.bf16 %v915_v63, %v914_v62  ;;  %v916_v29 = vmul.f32 %v1414_v0, %v1750_v36 }
 0x385   : > { %v1416_v34 = vpop.eup %1415 }
 0x386   : > { %v891_v16 = vpop.xlane.xlu1 %890  ;;  %1292 = vmatmul.mubr.bf16.gmra.mrb[20].mxu1 %v927_v28  ;;  %v917_v1 = vmul.f32 %v1416_v34, %v1758_v18  ;;  %v1418_v30 = vpop.eup %1417 }
 0x387   : > { %1427 = vrcp.f32 %v891_v16  ;;  %v918_v61 = vmul.f32 %v1418_v30, %v1760_v38 }
 0x388   : > { %v928_v32 = vpack.c.bf16 %v917_v1, %v916_v29 }
 0x389   : > { %v1420_v3 = vpop.eup %1419 }
 0x38a   : > { %1295 = vmatprep.mubr.bf16.mxu1 %v928_v32  ;;  %v919_v2 = vmul.f32 %v1420_v3, %v1764_v22  ;;  %v1422_v43 = vpop.eup %1421 }
 0x38b   : > { %v920_v56 = vmul.f32 %v1422_v43, %v1766_v23 }
 0x38c   : > { %v929_v46 = vpack.c.bf16 %v919_v2, %v918_v61 }
 0x38d   : > { %v1424_v50 = vpop.eup %1423 }
 0x38e   : > { %v1426_v53 = vpop.eup %1425  ;;  %1296 = vmatmul.mubr.bf16.gmra.mrb[24].mxu1 %v929_v46  ;;  %v921_v36 = vmul.f32 %v1424_v50, %v1770_v48 }
 0x38f   : > { %v922_v4 = vmul.f32 %v1426_v53, %v1772_v24 }
 0x390   : > { %v930_v60 = vpack.c.bf16 %v921_v36, %v920_v56 }
 0x391   : > { %v1428_v37 = vpop.eup %1427 }
 0x392   : > { %v923_v5 = vmul.f32 %v1428_v37, %v1776_v25  ;;  %1299 = vmatprep.mubr.bf16.mxu1 %v930_v60 }
 0x394   : > { %v931_v18 = vpack.c.bf16 %v923_v5, %v922_v4 }
 0x396   : > { %1300 = vmatmul.mubr.bf16.gmra.mrb[28].mxu1 %v931_v18 }
 0x451   : > { %v1289_v20 = vpop.f32.mrb[16].mxu1 }
 0x452   : > { %1031 = vst [vmem:[%s1799_s14 + $0x10] sm:$0xff] %v1289_v20  ;;  %v966_v38 = vpop.f32.mrb[17].mxu1 }
 0x453   : > { %1029 = vst [vmem:[%s1799_s14] sm:$0xff] %v966_v38  ;;  %v1290_v21 = vpop.f32.mrb[18].mxu1 }
 0x454   : > { %1032 = vst [vmem:[%s1799_s14 + $0x18] sm:$0xff] %v1290_v21  ;;  %v969_v22 = vpop.f32.mrb[19].mxu1 }
 0x455   : > { %1030 = vst [vmem:[%s1799_s14 + $0x8] sm:$0xff] %v969_v22 }
 0x459   : > { %v1293_v23 = vpop.f32.mrb[20].mxu1 }
 0x45a   : > { %1035 = vst [vmem:[%s1799_s14 + $0x30] sm:$0xff] %v1293_v23  ;;  %v982_v48 = vpop.f32.mrb[21].mxu1 }
 0x45b   : > { %1033 = vst [vmem:[%s1799_s14 + $0x20] sm:$0xff] %v982_v48  ;;  %v1294_v24 = vpop.f32.mrb[22].mxu1 }
 0x45c   : > { %1036 = vst [vmem:[%s1799_s14 + $0x38] sm:$0xff] %v1294_v24  ;;  %v985_v25 = vpop.f32.mrb[23].mxu1 }
 0x45d   : > { %1034 = vst [vmem:[%s1799_s14 + $0x28] sm:$0xff] %v985_v25 }
 0x461   : > { %v1297_v6 = vpop.f32.mrb[24].mxu1 }
 0x462   : > { %1039 = vst [vmem:[%s1799_s14 + $0x50] sm:$0xff] %v1297_v6  ;;  %v998_v7 = vpop.f32.mrb[25].mxu1 }
 0x463   : > { %1037 = vst [vmem:[%s1799_s14 + $0x40] sm:$0xff] %v998_v7  ;;  %v1298_v8 = vpop.f32.mrb[26].mxu1 }
 0x464   : > { %1040 = vst [vmem:[%s1799_s14 + $0x58] sm:$0xff] %v1298_v8  ;;  %v1001_v9 = vpop.f32.mrb[27].mxu1 }
 0x465   : > { %1038 = vst [vmem:[%s1799_s14 + $0x48] sm:$0xff] %v1001_v9 }
 0x469   : > { %v1301_v11 = vpop.f32.mrb[28].mxu1 }
 0x46a   : > { %1043 = vst [vmem:[%s1799_s14 + $0x70] sm:$0xff] %v1301_v11  ;;  %v1014_v12 = vpop.f32.mrb[29].mxu1 }
 0x46b   : > { %1041 = vst [vmem:[%s1799_s14 + $0x60] sm:$0xff] %v1014_v12  ;;  %v1302_v15 = vpop.f32.mrb[30].mxu1 }
 0x46c   : > { %1044 = vst [vmem:[%s1799_s14 + $0x78] sm:$0xff] %v1302_v15  ;;  %v1017_v27 = vpop.f32.mrb[31].mxu1 }
 0x46d   : > { %1042 = vst [vmem:[%s1799_s14 + $0x68] sm:$0xff] %v1017_v27 }
 0x46e PF: > { %s14_s12 = sadd.s32 1, %s1467_s12  }
 0x46f   : > { %p11_p3 = scmp.ge.s32.totalorder %s14_s12, 4  }
 0x471   :  { %13 = sbr.rel (!%p11_p3) target bundleno = 1 (0x1), region = 67 }
 0x478   :  { %1066 = vsyncpa [#allocation3], 1 }
 0x479   :  { %1068 = vsyncpa [#allocation3 + $0x1], 1 }

</bundles_post_ra>
